<compile_context>
chip_gen: v7x
topology: tpu7x:2x2x1
jax: 0.10.0
libtpu: 0.0.40
codegen_flags: <defaults>
</compile_context>

<pallas_src>
import jax
import jax.numpy as jnp
from jax.experimental import pallas as pl
from jax.experimental.pallas import tpu as pltpu

_LANE = 128          # lane width of a vreg
_MAX_TILE = 8192     # max batch lanes per block (tiny VMEM footprint: ~512 KiB)


def _round_up(n, m):
    return ((n + m - 1) // m) * m


def perceptron_kernel(w1_ref, b1_ref, w2_ref, b2_ref, x_ref, o_ref):
    """One batch tile of the 2 -> 2 -> 2 MLP.

    x_ref / o_ref : [2, TB] f32 in VMEM (features on sublanes, batch on lanes)
    w1/w2         : [2, 2]  f32 in SMEM (PyTorch layout: [out_features, in_features])
    b1/b2         : [2]     f32 in SMEM
    """
    x0 = x_ref[0:1, :]                                   # [1, TB]
    x1 = x_ref[1:2, :]                                   # [1, TB]

    # ---- layer 1: h = relu(x @ W1^T + b1) as VPU broadcast-FMAs ----------
    h0 = jnp.maximum(w1_ref[0, 0] * x0 + w1_ref[0, 1] * x1 + b1_ref[0], 0.0)
    h1 = jnp.maximum(w1_ref[1, 0] * x0 + w1_ref[1, 1] * x1 + b1_ref[1], 0.0)

    # ---- layer 2: y = h @ W2^T + b2 ---------------------------------------
    y0 = w2_ref[0, 0] * h0 + w2_ref[0, 1] * h1 + b2_ref[0]
    y1 = w2_ref[1, 0] * h0 + w2_ref[1, 1] * h1 + b2_ref[1]

    # ---- sigmoid: exp + approx reciprocal on the EUP, one Newton step on
    #      the VPU for full f32 accuracy -----------------------------------
    def _sigmoid(y):
        d = 1.0 + jnp.exp(-y)
        r = pl.reciprocal(d, approx=True)
        return r * (2.0 - d * r)                         # Newton refinement

    # Lane-dense, unmasked row stores into the [2, TB] output block.
    o_ref[0:1, :] = _sigmoid(y0)
    o_ref[1:2, :] = _sigmoid(y1)


def perceptron_forward(x, w1, b1, w2, b2):
    """x: [B, 2] f32 -> [B, 2] f32 (matches PyTorch Perceptron.forward)."""
    B = x.shape[0]

    # Batch on lanes, features on sublanes: [2, B]
    x_t = x.astype(jnp.float32).T

    # Largest lane-dense tile that makes sense; per-tile VMEM is
    # 2 rows x tb lanes x 4 B x (in + out) x 2 buffers <= ~512 KiB,
    # comfortably under v7x's 64 MiB VMEM / 32 MiB default scoped limit.
    tb = min(_MAX_TILE, _round_up(B, _LANE))
    n_blocks = pl.cdiv(B, tb)
    b_pad = n_blocks * tb
    if b_pad != B:
        x_t = jnp.pad(x_t, ((0, 0), (0, b_pad - B)))

    out_t = pl.pallas_call(
        perceptron_kernel,
        out_shape=jax.ShapeDtypeStruct((2, b_pad), jnp.float32),
        grid=(n_blocks,),
        in_specs=[
            pl.BlockSpec(memory_space=pltpu.SMEM),        # w1 [2, 2] scalars
            pl.BlockSpec(memory_space=pltpu.SMEM),        # b1 [2]
            pl.BlockSpec(memory_space=pltpu.SMEM),        # w2 [2, 2]
            pl.BlockSpec(memory_space=pltpu.SMEM),        # b2 [2]
            pl.BlockSpec((2, tb), lambda i: (0, i)),      # x  [2, TB] per block
        ],
        out_specs=pl.BlockSpec((2, tb), lambda i: (0, i)),
        compiler_params=pltpu.CompilerParams(
            dimension_semantics=("parallel",),            # shard batch across TCs (v7x)
        ),
    )(w1, b1, w2, b2, x_t)

    # Back to the PyTorch layout [B, 2].
    return out_t[:, :B].T


def init_params(key):
    """Deterministic init mimicking nn.Linear default (uniform +-1/sqrt(fan_in))."""
    k1, k2, k3, k4 = jax.random.split(key, 4)
    bound = 1.0 / jnp.sqrt(2.0)
    w1 = jax.random.uniform(k1, (2, 2), jnp.float32, -bound, bound)  # [out, in]
    b1 = jax.random.uniform(k2, (2,), jnp.float32, -bound, bound)
    w2 = jax.random.uniform(k3, (2, 2), jnp.float32, -bound, bound)
    b2 = jax.random.uniform(k4, (2,), jnp.float32, -bound, bound)
    return w1, b1, w2, b2


def reference_forward(x, w1, b1, w2, b2):
    h = jnp.maximum(x @ w1.T + b1, 0.0)
    return jax.nn.sigmoid(h @ w2.T + b2)


if __name__ == "__main__":
    key = jax.random.PRNGKey(0)
    k_params, k_x = jax.random.split(key)
    w1, b1, w2, b2 = init_params(k_params)

    batch = 8
    x = jax.random.normal(k_x, (batch, 2), jnp.float32)

    out = perceptron_forward(x, w1, b1, w2, b2)
    out = jax.block_until_ready(out)

    ref = reference_forward(x, w1, b1, w2, b2)
    assert out.shape == (batch, 2)
    assert jnp.allclose(out, ref, atol=1e-4, rtol=1e-4), float(
        jnp.max(jnp.abs(out - ref))
    )

    print("KERNEL_OK")
</pallas_src>

<mosaic_0001>
module attributes {stable_mosaic.version = 11 : i64} {
  func.func @perceptron_kernel(%arg0: i32, %arg1: memref<2x2xf32, #tpu.memory_space<smem>>, %arg2: memref<2xf32, #tpu.memory_space<smem>>, %arg3: memref<2x2xf32, #tpu.memory_space<smem>>, %arg4: memref<2xf32, #tpu.memory_space<smem>>, %arg5: memref<2x128xf32, #tpu.memory_space<vmem>>, %arg6: memref<2x128xf32, #tpu.memory_space<vmem>>) attributes {dimension_semantics = [#tpu.dimension_semantics<parallel>], iteration_bounds = array<i64: 1>, scalar_prefetch = 0 : i64, scratch_operands = 0 : i64, tpu.core_type = #tpu.core_type<tc>, window_params = [{transform_indices = @transform_0, window_bounds = array<i64: 2, 2>}, {transform_indices = @transform_1, window_bounds = array<i64: 2>}, {transform_indices = @transform_2, window_bounds = array<i64: 2, 2>}, {transform_indices = @transform_3, window_bounds = array<i64: 2>}, {transform_indices = @transform_4, window_bounds = array<i64: 2, 128>}, {transform_indices = @transform_5, window_bounds = array<i64: 2, 128>}]} {
    %c0 = arith.constant 0 : index
    %c0_0 = arith.constant 0 : index
    %0 = vector.load %arg5[%c0, %c0_0] : memref<2x128xf32, #tpu.memory_space<vmem>>, vector<1x128xf32>
    %c1 = arith.constant 1 : index
    %c0_1 = arith.constant 0 : index
    %1 = vector.load %arg5[%c1, %c0_1] : memref<2x128xf32, #tpu.memory_space<vmem>>, vector<1x128xf32>
    %c0_2 = arith.constant 0 : index
    %c0_3 = arith.constant 0 : index
    %2 = memref.load %arg1[%c0_2, %c0_3] : memref<2x2xf32, #tpu.memory_space<smem>>
    %3 = vector.broadcast %2 : f32 to vector<1x128xf32>
    %4 = arith.mulf %3, %0 : vector<1x128xf32>
    %c0_4 = arith.constant 0 : index
    %c1_5 = arith.constant 1 : index
    %5 = memref.load %arg1[%c0_4, %c1_5] : memref<2x2xf32, #tpu.memory_space<smem>>
    %6 = vector.broadcast %5 : f32 to vector<1x128xf32>
    %7 = arith.mulf %6, %1 : vector<1x128xf32>
    %8 = arith.addf %4, %7 : vector<1x128xf32>
    %c0_6 = arith.constant 0 : index
    %9 = memref.load %arg2[%c0_6] : memref<2xf32, #tpu.memory_space<smem>>
    %10 = vector.broadcast %9 : f32 to vector<1x128xf32>
    %11 = arith.addf %8, %10 : vector<1x128xf32>
    %cst = arith.constant 0.000000e+00 : f32
    %12 = vector.broadcast %cst : f32 to vector<1x128xf32>
    %13 = arith.maximumf %11, %12 : vector<1x128xf32>
    %c1_7 = arith.constant 1 : index
    %c0_8 = arith.constant 0 : index
    %14 = memref.load %arg1[%c1_7, %c0_8] : memref<2x2xf32, #tpu.memory_space<smem>>
    %15 = vector.broadcast %14 : f32 to vector<1x128xf32>
    %16 = arith.mulf %15, %0 : vector<1x128xf32>
    %c1_9 = arith.constant 1 : index
    %c1_10 = arith.constant 1 : index
    %17 = memref.load %arg1[%c1_9, %c1_10] : memref<2x2xf32, #tpu.memory_space<smem>>
    %18 = vector.broadcast %17 : f32 to vector<1x128xf32>
    %19 = arith.mulf %18, %1 : vector<1x128xf32>
    %20 = arith.addf %16, %19 : vector<1x128xf32>
    %c1_11 = arith.constant 1 : index
    %21 = memref.load %arg2[%c1_11] : memref<2xf32, #tpu.memory_space<smem>>
    %22 = vector.broadcast %21 : f32 to vector<1x128xf32>
    %23 = arith.addf %20, %22 : vector<1x128xf32>
    %cst_12 = arith.constant 0.000000e+00 : f32
    %24 = vector.broadcast %cst_12 : f32 to vector<1x128xf32>
    %25 = arith.maximumf %23, %24 : vector<1x128xf32>
    %c0_13 = arith.constant 0 : index
    %c0_14 = arith.constant 0 : index
    %26 = memref.load %arg3[%c0_13, %c0_14] : memref<2x2xf32, #tpu.memory_space<smem>>
    %27 = vector.broadcast %26 : f32 to vector<1x128xf32>
    %28 = arith.mulf %27, %13 : vector<1x128xf32>
    %c0_15 = arith.constant 0 : index
    %c1_16 = arith.constant 1 : index
    %29 = memref.load %arg3[%c0_15, %c1_16] : memref<2x2xf32, #tpu.memory_space<smem>>
    %30 = vector.broadcast %29 : f32 to vector<1x128xf32>
    %31 = arith.mulf %30, %25 : vector<1x128xf32>
    %32 = arith.addf %28, %31 : vector<1x128xf32>
    %c0_17 = arith.constant 0 : index
    %33 = memref.load %arg4[%c0_17] : memref<2xf32, #tpu.memory_space<smem>>
    %34 = vector.broadcast %33 : f32 to vector<1x128xf32>
    %35 = arith.addf %32, %34 : vector<1x128xf32>
    %c1_18 = arith.constant 1 : index
    %c0_19 = arith.constant 0 : index
    %36 = memref.load %arg3[%c1_18, %c0_19] : memref<2x2xf32, #tpu.memory_space<smem>>
    %37 = vector.broadcast %36 : f32 to vector<1x128xf32>
    %38 = arith.mulf %37, %13 : vector<1x128xf32>
    %c1_20 = arith.constant 1 : index
    %c1_21 = arith.constant 1 : index
    %39 = memref.load %arg3[%c1_20, %c1_21] : memref<2x2xf32, #tpu.memory_space<smem>>
    %40 = vector.broadcast %39 : f32 to vector<1x128xf32>
    %41 = arith.mulf %40, %25 : vector<1x128xf32>
    %42 = arith.addf %38, %41 : vector<1x128xf32>
    %c1_22 = arith.constant 1 : index
    %43 = memref.load %arg4[%c1_22] : memref<2xf32, #tpu.memory_space<smem>>
    %44 = vector.broadcast %43 : f32 to vector<1x128xf32>
    %45 = arith.addf %42, %44 : vector<1x128xf32>
    %cst_23 = arith.constant 0.000000e+00 : f32
    %46 = vector.broadcast %cst_23 : f32 to vector<1x128xf32>
    %47 = arith.subf %46, %35 : vector<1x128xf32>
    %48 = math.exp %47 : vector<1x128xf32>
    %cst_24 = arith.constant 1.000000e+00 : f32
    %49 = vector.broadcast %cst_24 : f32 to vector<1x128xf32>
    %50 = arith.addf %49, %48 : vector<1x128xf32>
    %51 = tpu.reciprocal %50 {approx = true} : vector<1x128xf32> -> vector<1x128xf32>
    %52 = arith.mulf %50, %51 : vector<1x128xf32>
    %cst_25 = arith.constant 2.000000e+00 : f32
    %53 = vector.broadcast %cst_25 : f32 to vector<1x128xf32>
    %54 = arith.subf %53, %52 : vector<1x128xf32>
    %55 = arith.mulf %51, %54 : vector<1x128xf32>
    %c0_26 = arith.constant 0 : index
    %c0_27 = arith.constant 0 : index
    %56 = vector.load %arg6[%c0_26, %c0_27] : memref<2x128xf32, #tpu.memory_space<vmem>>, vector<1x128xf32>
    tpu.vector_store %arg6[%c0_26, %c0_27], %55 {strides = array<i32>} : memref<2x128xf32, #tpu.memory_space<vmem>>, vector<1x128xf32>,
    %cst_28 = arith.constant 0.000000e+00 : f32
    %57 = vector.broadcast %cst_28 : f32 to vector<1x128xf32>
    %58 = arith.subf %57, %45 : vector<1x128xf32>
    %59 = math.exp %58 : vector<1x128xf32>
    %cst_29 = arith.constant 1.000000e+00 : f32
    %60 = vector.broadcast %cst_29 : f32 to vector<1x128xf32>
    %61 = arith.addf %60, %59 : vector<1x128xf32>
    %62 = tpu.reciprocal %61 {approx = true} : vector<1x128xf32> -> vector<1x128xf32>
    %63 = arith.mulf %61, %62 : vector<1x128xf32>
    %cst_30 = arith.constant 2.000000e+00 : f32
    %64 = vector.broadcast %cst_30 : f32 to vector<1x128xf32>
    %65 = arith.subf %64, %63 : vector<1x128xf32>
    %66 = arith.mulf %62, %65 : vector<1x128xf32>
    %c1_31 = arith.constant 1 : index
    %c0_32 = arith.constant 0 : index
    %67 = vector.load %arg6[%c1_31, %c0_32] : memref<2x128xf32, #tpu.memory_space<vmem>>, vector<1x128xf32>
    tpu.vector_store %arg6[%c1_31, %c0_32], %66 {strides = array<i32>} : memref<2x128xf32, #tpu.memory_space<vmem>>, vector<1x128xf32>,
    return
  }
  func.func @transform_0(%arg0: i32) -> (i32, i32) {
    %c0_i32 = arith.constant 0 : i32
    %c0_i32_0 = arith.constant 0 : i32
    %c0_i32_1 = arith.constant 0 : i32
    return %c0_i32, %c0_i32_0 : i32, i32
  }
  func.func @transform_1(%arg0: i32) -> i32 {
    %c0_i32 = arith.constant 0 : i32
    %c0_i32_0 = arith.constant 0 : i32
    return %c0_i32 : i32
  }
  func.func @transform_2(%arg0: i32) -> (i32, i32) {
    %c0_i32 = arith.constant 0 : i32
    %c0_i32_0 = arith.constant 0 : i32
    %c0_i32_1 = arith.constant 0 : i32
    return %c0_i32, %c0_i32_0 : i32, i32
  }
  func.func @transform_3(%arg0: i32) -> i32 {
    %c0_i32 = arith.constant 0 : i32
    %c0_i32_0 = arith.constant 0 : i32
    return %c0_i32 : i32
  }
  func.func @transform_4(%arg0: i32) -> (i32, i32) {
    %c0_i32 = arith.constant 0 : i32
    %c0_i32_0 = arith.constant 0 : i32
    return %c0_i32, %arg0 : i32, i32
  }
  func.func @transform_5(%arg0: i32) -> (i32, i32) {
    %c0_i32 = arith.constant 0 : i32
    %c0_i32_0 = arith.constant 0 : i32
    return %c0_i32, %arg0 : i32, i32
  }
}

</mosaic_0001>

<bundles_post_ra>
// kernel: tpu_custom_call.1
= control target key start
LH: loop header
LB: loop body
LE: loop exit
PB: predicated region body
PF: predicated region fallthrough
CT: control target
= control target key end

     0   :  { %10 = vsyncpa [#allocation4], 0  ;;  %s317_s0 = inlined_call_operand.hbm [shape: f32[2,2], index: 0, kind: input, shape index: {}]   ;;  %s318_s1 = inlined_call_operand.vmem [shape: f32[2], index: 1, kind: input, shape index: {}]   ;;  %s319_s2 = inlined_call_operand.vmem [shape: f32[2,2], index: 2, kind: input, shape index: {}]   ;;  %s320_s3 = inlined_call_operand.vmem [shape: f32[2], index: 3, kind: input, shape index: {}]   ;;  %s321_s4 = inlined_call_operand.vmem [shape: f32[2,128], index: 4, kind: input, shape index: {}]   ;;  %s322_s5 = inlined_call_operand.hbm [shape: f32[2,128], index: 5, kind: output, shape index: {}]  }
   0x1   :  { %11 = vsyncpa [#allocation5], 0 }
   0x2   :  { %12 = vsyncpa [#allocation8], 0  ;;  %s38_s20 = sshll.u32 %s319_s2, 4  ;;  %s39_s20 = int_to_ptr.vmem [resolvable:$true] %s38_s20 }
   0x3   :  { %13 = vsyncpa [#allocation3], 0  ;;  %s167_s21 = scalar_lea.vmem %s39_s20, 32  ;;  %p172_p1 = scmp.lt.s32.totalorder %s39_s20, %s39_s20 }
   0x4   :  { %p168_p0 = scmp.ne.s32.totalorder %s39_s20, %s167_s21  ;;  %p173_p2 = scmp.lt.s32.totalorder %s167_s21, %s167_s21 }
   0x6   :  { %p174_p3 = por %p173_p2, %p172_p1 }
   0x8   :  { %p175_p4 = pnand %p174_p3, %p168_p0 }
   0xa   :  { %178 = shalt.err (!%p175_p4)
}
   0xb   :  { %s243_s22 = smov [#allocation7]   ;;  %s179_s25 = scalar_lea.hbm %s317_s0, 32 }
   0xc   :  { %41 = dma.vmem_to_smem %s39_s20, 32, %s243_s22, [#allocation8]  }
   0xd   :  { %p180_p5 = scmp.ne.s32.totalorder %s317_s0, %s179_s25  ;;  %p183_p6 = scmp.lt.u32.totalorder %s179_s25, %s317_s0 }
   0xf   :  { %p185_p7 = pnand %p183_p6, %p180_p5 }
  0x11   :  { %188 = shalt.err (!%p185_p7)
}
  0x12   :  { %s244_s29 = smov [#allocation2]   ;;  %s28_s9 = sshll.u32 %s318_s1, 4  ;;  %s29_s9 = int_to_ptr.vmem [resolvable:$true] %s28_s9 }
  0x13   :  { %21 = dma.hbm_to_smem %s317_s0, 32, %s244_s29, [#allocation4]  }
  0x14   :  { %s48_s12 = sshll.u32 %s320_s3, 4  ;;  %s189_s13 = scalar_lea.vmem %s29_s9, 16  ;;  %s49_s12 = int_to_ptr.vmem [resolvable:$true] %s48_s12 }
  0x15   :  { %p190_p8 = scmp.ne.s32.totalorder %s29_s9, %s189_s13  ;;  %p194_p9 = scmp.lt.s32.totalorder %s29_s9, %s29_s9 }
  0x16   :  { %p195_p10 = scmp.lt.s32.totalorder %s189_s13, %s189_s13 }
  0x18   :  { %p196_p11 = por %p195_p10, %p194_p9 }
  0x1a   :  { %p197_p12 = pnand %p196_p11, %p190_p8 }
  0x1c   :  { %200 = shalt.err (!%p197_p12)
}
  0x1d   :  { %s245_s14 = smov [#allocation6]   ;;  %s201_s0 = scalar_lea.vmem %s49_s12, 16 }
  0x1e   :  { %31 = dma.vmem_to_smem %s29_s9, 16, %s245_s14, [#allocation5]  }
  0x1f   :  { %p202_p13 = scmp.ne.s32.totalorder %s49_s12, %s201_s0  ;;  %p206_p0 = scmp.lt.s32.totalorder %s49_s12, %s49_s12 }
  0x20   :  { %p207_p1 = scmp.lt.s32.totalorder %s201_s0, %s201_s0 }
  0x22   :  { %p208_p2 = por %p207_p1, %p206_p0 }
  0x24   :  { %p209_p3 = pnand %p208_p2, %p202_p13 }
  0x26   :  { %212 = shalt.err (!%p209_p3)
}
  0x27   :  { %s246_s1 = smov [#allocation9]  }
  0x28   :  { %51 = dma.vmem_to_smem %s49_s12, 16, %s246_s1, [#allocation8]  }
  0x29   :  { %235 = dma.done.wait [#allocation4], 32  }
  0x2a   :  { %236 = vsyncadd [#allocation4], 4294967264 }
  0x2b   :  { %237 = dma.done.wait [#allocation5], 16  }
  0x2c   :  { %238 = vsyncadd [#allocation5], 4294967280 }
  0x2d   :  { %239 = dma.done.wait [#allocation8], 48  }
  0x2e   :  { %240 = vsyncadd [#allocation8], 4294967248 }
  0x2f   :  { %66 = sfence }
  0x30   :  { %s69_s3 = sld [smem:[#allocation2]]  ;;  %s146_s15 = sld [smem:[#allocation2 + $0x1]]  ;;  %v67_v0 = vld [vmem:[%s321_s4] sm:$0x1]  ;;  %v68_v1 = vld [vmem:[%s321_s4 + $0x1] sm:$0x1] }
  0x31   :  { %s76_s16 = sld [smem:[#allocation6]]  ;;  %s148_s18 = sld [smem:[#allocation2 + $0x81]] }
  0x32   :  { %s147_s17 = sld [smem:[#allocation2 + $0x80]]  ;;  %s149_s19 = sld [smem:[#allocation6 + $0x1]] }
  0x33   :  { %s91_s24 = sld [smem:[#allocation7]]  ;;  %s150_s26 = sld [smem:[#allocation7 + $0x1]] }
  0x34   :  { %s151_s25 = sld [smem:[#allocation7 + $0x80]]  ;;  %s152_s27 = sld [smem:[#allocation7 + $0x81]] }
  0x35   :  { %s98_s2 = sld [smem:[#allocation9]]  ;;  %s153_s28 = sld [smem:[#allocation9 + $0x1]] }
  0x36   :  { %v70_v2 = vstv %s69_s3  ;;  %v73_v4 = vstv %s146_s15  ;;  %s247_s4 = smov [#allocation10]  }
  0x37   :  { %v71_v3 = vmul.f32 %v70_v2, %v67_v0  ;;  %v74_v5 = vmul.f32 %v73_v4, %v68_v1  ;;  %v84_v7 = vstv %s148_s18  ;;  %v77_v8 = vstv %s76_s16  ;;  %s135_s29 = sshll.u32 %s247_s4, 4  ;;  %s136_s29 = int_to_ptr.vmem [resolvable:$true] %s135_s29 }
  0x38   :  { %v81_v6 = vstv %s147_s17  ;;  %v85_v10 = vmul.f32 %v84_v7, %v68_v1  ;;  %v88_v12 = vstv %s149_s19  ;;  %s213_s30 = scalar_lea.vmem %s136_s29, 32  ;;  %p218_p5 = scmp.lt.s32.totalorder %s136_s29, %s136_s29 }
  0x39   :  { %v82_v9 = vmul.f32 %v81_v6, %v67_v0  ;;  %v75_v11 = vadd.f32 %v74_v5, %v71_v3  ;;  %v92_v16 = vstv %s91_s24  ;;  %v95_v19 = vstv %s150_s26  ;;  %p214_p4 = scmp.ne.s32.totalorder %s136_s29, %s213_s30  ;;  %p219_p6 = scmp.lt.s32.totalorder %s213_s30, %s213_s30 }
  0x3a   :  { %v102_v17 = vstv %s151_s25  ;;  %v105_v20 = vstv %s152_s27 }
  0x3b   :  { %v86_v13 = vadd.f32 %v85_v10, %v82_v9  ;;  %v78_v14 = vadd.f32 %v77_v8, %v75_v11  ;;  %v99_v26 = vstv %s98_s2  ;;  %v109_v27 = vstv %s153_s28  ;;  %p220_p7 = por %p219_p6, %p218_p5 }
  0x3d   :  { %v89_v15 = vadd.f32 %v88_v12, %v86_v13  ;;  %v79_v18 = vmax.f32 %v78_v14, 0.0  ;;  %p221_p8 = pnand %p220_p7, %p214_p4 }
  0x3f   :  { %v90_v21 = vmax.f32 %v89_v15, 0.0  ;;  %v93_v22 = vmul.f32 %v92_v16, %v79_v18  ;;  %v103_v23 = vmul.f32 %v102_v17, %v79_v18 }
  0x41   :  { %v96_v24 = vmul.f32 %v95_v19, %v90_v21  ;;  %v106_v25 = vmul.f32 %v105_v20, %v90_v21 }
  0x43   :  { %v97_v28 = vadd.f32 %v96_v24, %v93_v22  ;;  %v107_v29 = vadd.f32 %v106_v25, %v103_v23 }
  0x45   :  { %v100_v30 = vadd.f32 %v99_v26, %v97_v28  ;;  %v110_v31 = vadd.f32 %v109_v27, %v107_v29 }
  0x47   :  { %v111_v32 = vsub.f32 0.0, %v100_v30  ;;  %v120_v33 = vsub.f32 0.0, %v110_v31 }
  0x49   :  { %v112_v34 = vmul.f32 1.442695, %v111_v32  ;;  %v121_v35 = vmul.f32 1.442695, %v120_v33 }
  0x4b   :  { %159 = vpow2.f32 %v112_v34 }
  0x4c   :  { %161 = vpow2.f32 %v121_v35 }
  0x55   :  { %v160_v36 = vpop.eup %159 }
  0x56   :  { %v162_v37 = vpop.eup %161  ;;  %v114_v38 = vadd.f32 1.0, %v160_v36 }
  0x57   :  { %v123_v39 = vadd.f32 1.0, %v162_v37 }
  0x58   :  { %163 = vrcp.f32 %v114_v38 }
  0x59   :  { %165 = vrcp.f32 %v123_v39 }
  0x62   :  { %v164_v40 = vpop.eup %163 }
  0x63   :  { %v166_v41 = vpop.eup %165  ;;  %v116_v42 = vmul.f32 %v164_v40, %v114_v38 }
  0x64   :  { %v125_v43 = vmul.f32 %v166_v41, %v123_v39 }
  0x65   :  { %v117_v44 = vsub.f32 2.0, %v116_v42 }
  0x66   :  { %v126_v45 = vsub.f32 2.0, %v125_v43 }
  0x67   :  { %v118_v46 = vmul.f32 %v164_v40, %v117_v44 }
  0x68   :  { %v127_v47 = vmul.f32 %v166_v41, %v126_v45 }
  0x69   :  { %119 = vst [vmem:[#allocation10] sm:$0x1] %v118_v46 }
  0x6a   :  { %128 = vst [vmem:[#allocation10 + $0x1] sm:$0x1] %v127_v47 }
  0x6b   :  { %224 = shalt.err (!%p221_p8)
}
  0x6c   :  { %s225_s8 = scalar_lea.hbm %s322_s5, 32 }
  0x6d   :  { %p226_p9 = scmp.ne.s32.totalorder %s322_s5, %s225_s8  ;;  %p229_p10 = scmp.lt.u32.totalorder %s225_s8, %s322_s5 }
  0x6f   :  { %p231_p11 = pnand %p229_p10, %p226_p9 }
  0x71   :  { %234 = shalt.err (!%p231_p11)
}
  0x72   :  { %138 = dma.vmem_to_hbm [thread:$0]  %s136_s29, 32, %s322_s5, [#allocation3]  }
  0x73   :  { %241 = dma.done.wait [#allocation3], 32  }
  0x74   :  { %242 = vsyncadd [#allocation3], 4294967264 }
  0x75   :  { %142 = vsyncpa [#allocation3], 1 }
  0x76   :  { %143 = vsyncpa [#allocation4], 1 }
  0x77   :  { %144 = vsyncpa [#allocation5], 1 }
  0x78   :  { %145 = vsyncpa [#allocation8], 1 }

</bundles_post_ra>
